<compile_context>
chip_gen: v7x
topology: tpu7x:2x2x1
jax: 0.10.0
libtpu: 0.0.40
codegen_flags: <defaults>
</compile_context>

<pallas_src>
import jax
import jax.numpy as jnp
from jax.experimental import pallas as pl
from jax.experimental.pallas import tpu as pltpu


def _round_up(x, m):
    return (x + m - 1) // m * m


_VMEM_BUDGET = 36 * 1024 * 1024   # per-step working-set target (fits all generations)
_VMEM_LIMIT = 48 * 1024 * 1024


def _choose_tm(m, cpad):
    """Largest row tile (<=512) whose double-buffered working set fits the budget."""
    tm = min(512, _round_up(m, 8))
    w_bytes = 2 * cpad * cpad * 2          # double-buffered bf16 weight block
    b_bytes = 2 * cpad * 4
    while tm > 8:
        xio_bytes = 2 * 2 * tm * cpad * 4  # double-buffered x tile + out tile (f32)
        if w_bytes + b_bytes + xio_bytes <= _VMEM_BUDGET:
            break
        tm //= 2
    return max(tm, 8)


def _fused_linear_residual_kernel(x_ref, w_ref, b_ref, o_ref):
    # x_ref: (TM, Cpad) f32, w_ref: (Cpad, Cpad) bf16, b_ref: (1, Cpad) f32
    x = x_ref[...]
    y = jnp.dot(x.astype(w_ref.dtype), w_ref[...],
                preferred_element_type=jnp.float32)
    o_ref[...] = (y + b_ref[...] + x).astype(o_ref.dtype)


def fused_linear_residual(x_stacked, w_stacked, b_stacked, *, tm):
    """x_stacked: (S, Mpad, Cpad) f32; w_stacked: (S, Cpad, Cpad) bf16;
    b_stacked: (S, 1, Cpad) f32.  Returns x @ W + b + x per stream."""
    s, mpad, cpad = x_stacked.shape
    grid = (s, mpad // tm)

    cost = pl.CostEstimate(
        flops=2 * s * mpad * cpad * cpad,
        transcendentals=0,
        bytes_accessed=(2 * s * mpad * cpad * 4      # x read + out write (f32)
                        + s * cpad * cpad * 2        # bf16 weights
                        + s * cpad * 4),             # bias
    )

    return pl.pallas_call(
        _fused_linear_residual_kernel,
        out_shape=jax.ShapeDtypeStruct((s, mpad, cpad), x_stacked.dtype),
        grid_spec=pltpu.PrefetchScalarGridSpec(
            num_scalar_prefetch=0,
            grid=grid,
            in_specs=[
                pl.BlockSpec((None, tm, cpad), lambda st, i: (st, i, 0)),
                pl.BlockSpec((None, cpad, cpad), lambda st, i: (st, 0, 0)),
                pl.BlockSpec((None, 1, cpad), lambda st, i: (st, 0, 0)),
            ],
            out_specs=pl.BlockSpec((None, tm, cpad), lambda st, i: (st, i, 0)),
        ),
        compiler_params=pltpu.CompilerParams(
            dimension_semantics=("parallel", "parallel"),
            vmem_limit_bytes=_VMEM_LIMIT,
        ),
        input_output_aliases={0: 0},   # out overwrites the padded/stacked x buffer
        cost_estimate=cost,
    )(x_stacked, w_stacked, b_stacked)


@jax.jit
def _residual_forward(value, pos, w_stacked, b_stacked):
    bsz, seq, c = value.shape
    cpad = w_stacked.shape[-1]
    m = bsz * seq
    tm = _choose_tm(m, cpad)
    mpad = _round_up(m, tm)

    def prep(x):
        x2d = x.reshape(m, c)
        return jnp.pad(x2d, ((0, mpad - m), (0, cpad - c)))

    x_stacked = jnp.stack([prep(value), prep(pos)], axis=0)   # (2, Mpad, Cpad)
    out = fused_linear_residual(x_stacked, w_stacked, b_stacked, tm=tm)
    out_val = out[0, :m, :c].reshape(bsz, seq, c)
    out_pos = out[1, :m, :c].reshape(bsz, seq, c)
    return out_val, out_pos


class ResidualPallas:
    """JAX/Pallas equivalent of Residual(fn) with fn = per-stream Linear."""

    def __init__(self, hidden, key):
        kv, kp = jax.random.split(key)
        self.hidden = hidden
        self.cpad = max(128, _round_up(hidden, 128))

        # Deterministic synthetic parameters for fn (f32 masters, bf16 for the MXU).
        self.w_val = jax.random.normal(kv, (hidden, hidden), jnp.float32) * 0.02
        self.w_pos = jax.random.normal(kp, (hidden, hidden), jnp.float32) * 0.02
        self.b_val = jnp.zeros((1, hidden), jnp.float32)
        self.b_pos = jnp.zeros((1, hidden), jnp.float32)

        def pad_w(w):
            wp = jnp.zeros((self.cpad, self.cpad), jnp.float32)
            return wp.at[:hidden, :hidden].set(w).astype(jnp.bfloat16)

        def pad_b(b):
            return jnp.pad(b, ((0, 0), (0, self.cpad - hidden)))

        # Stacked (value, pos) parameters handed to the single fused pallas_call.
        self.w_stacked = jnp.stack([pad_w(self.w_val), pad_w(self.w_pos)], axis=0)
        self.b_stacked = jnp.stack([pad_b(self.b_val), pad_b(self.b_pos)], axis=0)

    def __call__(self, input_t):
        value, pos, x_mask = input_t          # value/pos: (B, N, C); x_mask: (B, N)
        out_val, out_pos = _residual_forward(value, pos, self.w_stacked, self.b_stacked)
        # x_mask passes through unchanged, exactly as in the PyTorch module.
        return (out_val, out_pos, x_mask)


if __name__ == "__main__":
    key = jax.random.PRNGKey(0)
    k_val, k_pos, k_param = jax.random.split(key, 3)

    B, N, C = 2, 8, 32
    value = jax.random.normal(k_val, (B, N, C), jnp.float32)
    pos = jax.random.normal(k_pos, (B, N, C), jnp.float32)
    x_mask = jnp.ones((B, N), jnp.bool_)

    module = ResidualPallas(hidden=C, key=k_param)
    out_val, out_pos, out_mask = module((value, pos, x_mask))
    jax.block_until_ready((out_val, out_pos, out_mask))

    # Pure-JAX reference of the fused fn(x) + x semantics (bf16 weights, f32 acc).
    def ref(x, w, b):
        x2d = x.reshape(B * N, C)
        y = jnp.dot(x2d.astype(jnp.bfloat16), w.astype(jnp.bfloat16),
                    preferred_element_type=jnp.float32)
        return (y + b + x2d).reshape(B, N, C)

    ref_val = ref(value, module.w_val, module.b_val)
    ref_pos = ref(pos, module.w_pos, module.b_pos)
    assert jnp.allclose(out_val, ref_val, atol=1e-3, rtol=1e-3)
    assert jnp.allclose(out_pos, ref_pos, atol=1e-3, rtol=1e-3)
    assert bool(jnp.all(out_mask == x_mask))

    print("KERNEL_OK")
</pallas_src>

<mosaic_0001>
module attributes {stable_mosaic.version = 11 : i64} {
  func.func @_fused_linear_residual_kernel(%arg0: i32, %arg1: i32, %arg2: memref<1x16x128xf32, #tpu.memory_space<vmem>>, %arg3: memref<1x128x128xbf16, #tpu.memory_space<vmem>>, %arg4: memref<1x1x128xf32, #tpu.memory_space<vmem>>, %arg5: memref<1x16x128xf32, #tpu.memory_space<vmem>>) attributes {dimension_semantics = [#tpu.dimension_semantics<parallel>, #tpu.dimension_semantics<parallel>], iteration_bounds = array<i64: 2, 1>, scalar_prefetch = 0 : i64, scratch_operands = 0 : i64, tpu.core_type = #tpu.core_type<tc>, window_params = [{transform_indices = @transform_0, window_bounds = array<i64: 1, 16, 128>}, {transform_indices = @transform_1, window_bounds = array<i64: 1, 128, 128>}, {transform_indices = @transform_2, window_bounds = array<i64: 1, 1, 128>}, {transform_indices = @transform_3, window_bounds = array<i64: 1, 16, 128>}]} {
    %c0 = arith.constant 0 : index
    %c0_0 = arith.constant 0 : index
    %c0_1 = arith.constant 0 : index
    %0 = vector.load %arg2[%c0, %c0_0, %c0_1] : memref<1x16x128xf32, #tpu.memory_space<vmem>>, vector<1x16x128xf32>
    %1 = vector.shape_cast %0 : vector<1x16x128xf32> to vector<16x128xf32>
    %2 = arith.truncf %1 : vector<16x128xf32> to vector<16x128xbf16>
    %c0_2 = arith.constant 0 : index
    %c0_3 = arith.constant 0 : index
    %c0_4 = arith.constant 0 : index
    %3 = vector.load %arg3[%c0_2, %c0_3, %c0_4] : memref<1x128x128xbf16, #tpu.memory_space<vmem>>, vector<1x128x128xbf16>
    %4 = vector.shape_cast %3 : vector<1x128x128xbf16> to vector<128x128xbf16>
    %cst = arith.constant dense<0.000000e+00> : vector<16x128xf32>
    %5 = tpu.matmul %2, %4, %cst {dimension_numbers = #tpu.dot_dimension_numbers<[1], [0], [0], [1], [0, 0, 1, 1], [], []>} : vector<16x128xbf16>, vector<128x128xbf16>, vector<16x128xf32> -> vector<16x128xf32>
    %c0_5 = arith.constant 0 : index
    %c0_6 = arith.constant 0 : index
    %c0_7 = arith.constant 0 : index
    %6 = vector.load %arg4[%c0_5, %c0_6, %c0_7] : memref<1x1x128xf32, #tpu.memory_space<vmem>>, vector<1x1x128xf32>
    %7 = vector.shape_cast %6 : vector<1x1x128xf32> to vector<1x128xf32>
    %8 = vector.broadcast %7 : vector<1x128xf32> to vector<16x128xf32>
    %9 = arith.addf %5, %8 : vector<16x128xf32>
    %10 = arith.addf %9, %1 : vector<16x128xf32>
    %c0_8 = arith.constant 0 : index
    %c0_9 = arith.constant 0 : index
    %c0_10 = arith.constant 0 : index
    %11 = vector.load %arg5[%c0_8, %c0_9, %c0_10] : memref<1x16x128xf32, #tpu.memory_space<vmem>>, vector<1x16x128xf32>
    %12 = vector.shape_cast %11 : vector<1x16x128xf32> to vector<16x128xf32>
    %13 = vector.shape_cast %10 : vector<16x128xf32> to vector<1x16x128xf32>
    tpu.vector_store %arg5[%c0_8, %c0_9, %c0_10], %13 {strides = array<i32>} : memref<1x16x128xf32, #tpu.memory_space<vmem>>, vector<1x16x128xf32>,
    return
  }
  func.func @transform_0(%arg0: i32, %arg1: i32) -> (i32, i32, i32) {
    %c0_i32 = arith.constant 0 : i32
    %c0_i32_0 = arith.constant 0 : i32
    return %arg0, %arg1, %c0_i32 : i32, i32, i32
  }
  func.func @transform_1(%arg0: i32, %arg1: i32) -> (i32, i32, i32) {
    %c0_i32 = arith.constant 0 : i32
    %c0_i32_0 = arith.constant 0 : i32
    %c0_i32_1 = arith.constant 0 : i32
    return %arg0, %c0_i32, %c0_i32_0 : i32, i32, i32
  }
  func.func @transform_2(%arg0: i32, %arg1: i32) -> (i32, i32, i32) {
    %c0_i32 = arith.constant 0 : i32
    %c0_i32_0 = arith.constant 0 : i32
    %c0_i32_1 = arith.constant 0 : i32
    return %arg0, %c0_i32, %c0_i32_0 : i32, i32, i32
  }
  func.func @transform_3(%arg0: i32, %arg1: i32) -> (i32, i32, i32) {
    %c0_i32 = arith.constant 0 : i32
    %c0_i32_0 = arith.constant 0 : i32
    return %arg0, %arg1, %c0_i32 : i32, i32, i32
  }
}

</mosaic_0001>

<bundles_post_ra>
// kernel: _residual_forward.1
= control target key start
LH: loop header
LB: loop body
LE: loop exit
PB: predicated region body
PF: predicated region fallthrough
CT: control target
= control target key end

     0   :  { %s606_s12 = smov 0   ;;  %s608_s13 = smov 0   ;;  %s650_s0 = inlined_call_operand.vmem [shape: f32[2,16,128], index: 0, kind: input, shape index: {}, may-alias: {0,3}]   ;;  %s651_s1 = inlined_call_operand.vmem [shape: bf16[2,128,128], index: 1, kind: input, shape index: {}]   ;;  %s652_s2 = inlined_call_operand.vmem [shape: f32[2,1,128], index: 2, kind: input, shape index: {}]   ;;  %s653_s3 = inlined_call_operand.vmem [shape: f32[2,16,128], index: 3, kind: output, shape index: {}, may-alias: {0,3}]  }
   0x1   :  { %s610_s14 = smov 0  }
   0x2 LB: > { %s25_s15 = sadd.s32 1, %s578_s13  ;;  %p476_p0 = scmp.ge.s32.totalorder %s582_s14, 1  ;;  %s582_s14 = sphi %s610_s14, %s13_s14   ;;  %s578_s13 = sphi %s608_s13, %s655_s13   ;;  %s574_s12 = sphi %s606_s12, %s654_s12  }
   0x3   : > { %p27_p1 = scmp.ge.s32.totalorder %s25_s15, 2  ;;  %p176_p2 = scmp.lt.s32.totalorder %s582_s14, 3 }
   0x5   : > { %s657_s15 = smov (%p27_p1, %s25_s15), 0  ;;  %p177_p3 = pnand %p476_p0, %p176_p2 }
   0x6   : > { %p217_p4 = scmp.lt.s32.totalorder (!%p177_p3), %s574_s12, 1  ;;  %v584_v0 = vmov (!%p177_p3), 0.0   ;;  %vm585_vm0 = vmmov (!%p177_p3), 0  }
   0x7   : > { %180 = sbr.rel (%p177_p3) target bundleno = 268 (0x10c), region = 32  ;;  %506 = vmatprep.subr.bf16.mxu0 (!%p177_p3), %v584_v0  ;;  %522 = vmatprep.mubr.msk.bf16.mxu0 (!%p177_p3), %vm585_vm0, %v584_v0 }
   0xe   : > { %s659_s12 = smov (!%p217_p4, %s574_s12), 1 }
   0xf   : > { %s495_s16 = sshll.u32 %s659_s12, 6  ;;  %s494_s20 = sshll.u32 %s659_s12, 4 }
  0x10   : > { %s230_s19 = scalar_lea.vmem %s651_s1, %s495_s16  ;;  %s224_s23 = scalar_lea.vmem %s650_s0, %s494_s20 }
  0x11   : > { %v552_v1 = vld [vmem:[%s230_s19] sm:$0xff]   ;;  %v553_v2 = vld [vmem:[%s230_s19 + $0x8] sm:$0xff]   ;;  %v554_v3 = vld [vmem:[%s230_s19 + $0x10] sm:$0xff]   ;;  %s233_s26 = scalar_lea.vmem %s652_s2, %s659_s12  ;;  %s242_s29 = scalar_lea.vmem %s653_s3, %s494_s20 }
  0x12   : > { %507 = vmatpush3.bf16.msra.mxu0 %v552_v1  ;;  %v555_v4 = vld [vmem:[%s230_s19 + $0x18] sm:$0xff]   ;;  %v556_v5 = vld [vmem:[%s230_s19 + $0x20] sm:$0xff]   ;;  %v557_v6 = vld [vmem:[%s230_s19 + $0x28] sm:$0xff]  }
  0x13   : > { %508 = vmatprep.subr.bf16.mxu0 %v584_v0  ;;  %v558_v7 = vld [vmem:[%s230_s19 + $0x30] sm:$0xff]   ;;  %v559_v8 = vld [vmem:[%s230_s19 + $0x38] sm:$0xff]   ;;  %v245_v9 = vld [vmem:[%s224_s23] sm:$0xff] }
  0x14   : > { %v246_v10 = vld [vmem:[%s224_s23 + $0x8] sm:$0xff]  ;;  %v483_v12 = vld [vmem:[%s233_s26] ss:$0 sm:$0xff] }
  0x15   : > { %v247_v11 = vpack.c.bf16 %v246_v10, %v245_v9 }
  0x16   : > { %509 = vmatpush3.bf16.msra.mxu0 %v553_v2 }
  0x17   : > { %510 = vmatprep.subr.bf16.mxu0 %v584_v0 }
  0x1a   : > { %511 = vmatpush3.bf16.msra.mxu0 %v554_v3 }
  0x1b   : > { %512 = vmatprep.subr.bf16.mxu0 %v584_v0 }
  0x1e   : > { %513 = vmatpush3.bf16.msra.mxu0 %v555_v4 }
  0x1f   : > { %514 = vmatprep.subr.bf16.mxu0 %v584_v0 }
  0x22   : > { %515 = vmatpush3.bf16.msra.mxu0 %v556_v5 }
  0x23   : > { %516 = vmatprep.subr.bf16.mxu0 %v584_v0 }
  0x26   : > { %517 = vmatpush3.bf16.msra.mxu0 %v557_v6 }
  0x27   : > { %518 = vmatprep.subr.bf16.mxu0 %v584_v0 }
  0x2a   : > { %519 = vmatpush3.bf16.msra.mxu0 %v558_v7 }
  0x2b   : > { %520 = vmatprep.subr.bf16.mxu0 %v584_v0 }
  0x2e   : > { %521 = vmatpush3.bf16.msra.mxu0 %v559_v8 }
  0x31   : > { %523 = vmatmul.mubr.bf16.vlgmr.msra.gmra.mrb[0].mxu0 %v247_v11 }
 0x104   : > { %v353_v13 = vpop.f32.mrb[0].mxu0 }
 0x105   : > { %v354_v14 = vadd.f32 %v483_v12, %v353_v13  ;;  %v524_v15 = vpop.f32.mrb[1].mxu0 }
 0x106   : > { %v356_v16 = vpop.f32.mrb[2].mxu0 }
 0x107   : > { %v360_v17 = vadd.f32 %v354_v14, %v245_v9  ;;  %v357_v18 = vadd.f32 %v483_v12, %v356_v16  ;;  %v525_v19 = vpop.f32.mrb[3].mxu0 }
 0x109   : > { %362 = vst [vmem:[%s242_s29] sm:$0xff] %v360_v17  ;;  %v361_v20 = vadd.f32 %v357_v18, %v246_v10 }
 0x10b   : > { %363 = vst [vmem:[%s242_s29 + $0x8] sm:$0xff] %v361_v20 }
 0x10c PF: > { %s13_s14 = sadd.s32 1, %s582_s14   ;;  %s654_s12 = smov %s578_s13 }
 0x10d   : > { %p10_p5 = scmp.ge.s32.totalorder %s13_s14, 4   ;;  %s655_s13 = smov %s657_s15 }
 0x10f   :  { %12 = sbr.rel (!%p10_p5) target bundleno = 2 (0x2), region = 68 }

</bundles_post_ra>
